<compile_context>
chip_gen: v7x
topology: tpu7x:2x2x1
jax: 0.10.0
libtpu: 0.0.40
codegen_flags: <defaults>
</compile_context>

<pallas_src>
import math

import jax
import jax.numpy as jnp
from jax.experimental import pallas as pl
from jax.experimental.pallas import tpu as pltpu

_LANES = 256       # slab lane width: multiple of 128 so Box-Muller halves are lane-tile aligned
_ROW_ALIGN = 32    # row-tile quantum: multiple of the sublane tiling for f32/bf16/int8


def _plan_tiles(n_elems: int, itemsize: int) -> tuple[int, int]:
    """Pick (padded_rows, row_tile) for a flat array of n_elems elements."""
    rows = -(-n_elems // _LANES)
    # Bytes per slab row per grid step: 3 streamed arrays (mu, logvar, z),
    # double-buffered, plus ~6 full-width f32 temporaries inside the kernel.
    per_row = 2 * 3 * _LANES * itemsize + 6 * _LANES * 4
    budget = 12 << 20                                   # fits all generations w/ headroom
    tile = max(_ROW_ALIGN, (budget // per_row) // _ROW_ALIGN * _ROW_ALIGN)
    # Guarantee >= 2 grid steps once the problem is big enough to care, so the
    # "parallel" grid axis can shard across v7x's two TensorCores and the
    # BlockSpec pipeline has DMA/compute to overlap.
    if rows * _LANES * itemsize >= (1 << 20):
        tile = min(tile, max(_ROW_ALIGN, (rows // 2) // _ROW_ALIGN * _ROW_ALIGN))
    if rows <= tile:
        return rows, rows                               # single block (full-array dims)
    padded_rows = -(-rows // tile) * tile
    return padded_rows, tile


def _vae_sample_tpu_kernel(seed_ref, mu_ref, logvar_ref, z_ref):
    """z = mu + eps * exp(0.5*logvar); eps drawn with the TPU hardware PRNG."""
    # Independent noise stream per grid step (and per v7x TensorCore).
    pltpu.prng_seed(seed_ref[0], pl.program_id(0))

    tb, d = z_ref.shape
    half = d // 2                                       # == 128: one lane tile

    # Dual-channel Box-Muller: one log/sqrt/cos/sin set per TWO outputs
    # (keeps the EUP slot off the critical path on v7x).
    bits1 = pltpu.bitcast(pltpu.prng_random_bits((tb, half)), jnp.uint32)
    bits2 = pltpu.bitcast(pltpu.prng_random_bits((tb, half)), jnp.uint32)
    inv24 = jnp.float32(1.0 / 16777216.0)                   # 2**-24
    u1 = ((bits1 >> 8).astype(jnp.float32) + 1.0) * inv24   # (0, 1] -> log finite
    u2 = (bits2 >> 8).astype(jnp.float32) * inv24           # [0, 1)
    r = jnp.sqrt(-2.0 * jnp.log(u1))
    theta = jnp.float32(2.0 * math.pi) * u2

    # Compute/store each half directly on lane-tile-aligned slices so eps is
    # never materialized as a full-tile intermediate.  Math in f32; streams
    # stay in the caller's dtype (e.g. bf16).
    mu_lo = mu_ref[:, :half].astype(jnp.float32)
    mu_hi = mu_ref[:, half:].astype(jnp.float32)
    std_lo = jnp.exp(0.5 * logvar_ref[:, :half].astype(jnp.float32))
    std_hi = jnp.exp(0.5 * logvar_ref[:, half:].astype(jnp.float32))
    z_ref[:, :half] = (mu_lo + (r * jnp.cos(theta)) * std_lo).astype(z_ref.dtype)
    z_ref[:, half:] = (mu_hi + (r * jnp.sin(theta)) * std_hi).astype(z_ref.dtype)


def _vae_sample_fused_kernel(mu_ref, logvar_ref, eps_ref, z_ref):
    """Portable path (non-TPU backends): eps precomputed in f32, fuse exp + FMA."""
    std = jnp.exp(0.5 * logvar_ref[...].astype(jnp.float32))
    z_ref[...] = (mu_ref[...].astype(jnp.float32) + eps_ref[...] * std).astype(z_ref.dtype)


def vae_sample(mu: jax.Array, logvar: jax.Array, seed: int) -> jax.Array:
    """Pallas implementation of VAE._sample(mu, logvar) for arrays of any shape."""
    assert mu.shape == logvar.shape and mu.dtype == logvar.dtype

    orig_shape = mu.shape
    out_dtype = mu.dtype
    n = mu.size
    itemsize = jnp.dtype(out_dtype).itemsize
    rows, tile = _plan_tiles(n, itemsize)
    n_pad = rows * _LANES

    # Repack into a lane-dense 2D slab (free layout plumbing: op is elementwise).
    mu_flat = mu.reshape(-1)
    lv_flat = logvar.reshape(-1)
    if n_pad != n:
        # Zero padding: exp(0) = 1 is finite; padded outputs are sliced off below.
        mu_flat = jnp.pad(mu_flat, (0, n_pad - n))
        lv_flat = jnp.pad(lv_flat, (0, n_pad - n))
    mu2 = mu_flat.reshape(rows, _LANES)
    lv2 = lv_flat.reshape(rows, _LANES)

    grid = (rows // tile,)
    out_shape = jax.ShapeDtypeStruct((rows, _LANES), out_dtype)
    cparams = pltpu.CompilerParams(
        dimension_semantics=("parallel",),
        vmem_limit_bytes=32 * 1024 * 1024,
    )

    if jax.default_backend() == "tpu":
        seed_arr = jnp.asarray([seed], dtype=jnp.int32)
        grid_spec = pltpu.PrefetchScalarGridSpec(
            num_scalar_prefetch=1,                          # seed lands in SMEM
            grid=grid,
            in_specs=[
                pl.BlockSpec((tile, _LANES), lambda i, s_ref: (i, 0)),
                pl.BlockSpec((tile, _LANES), lambda i, s_ref: (i, 0)),
            ],
            out_specs=pl.BlockSpec((tile, _LANES), lambda i, s_ref: (i, 0)),
        )
        z2 = pl.pallas_call(
            _vae_sample_tpu_kernel,
            out_shape=out_shape,
            grid_spec=grid_spec,
            compiler_params=cparams,
        )(seed_arr, mu2, lv2)
    else:
        # Non-TPU backends (pltpu.prng_* cannot lower): draw f32 eps outside,
        # keep exp + FMA fused.
        eps = jax.random.normal(jax.random.PRNGKey(seed), (rows, _LANES),
                                dtype=jnp.float32)
        z2 = pl.pallas_call(
            _vae_sample_fused_kernel,
            out_shape=out_shape,
            grid=grid,
            in_specs=[pl.BlockSpec((tile, _LANES), lambda i: (i, 0))] * 3,
            out_specs=pl.BlockSpec((tile, _LANES), lambda i: (i, 0)),
            compiler_params=cparams,
        )(mu2, lv2, eps)

    z_flat = z2.reshape(-1)
    if n_pad != n:
        z_flat = z_flat[:n]
    return z_flat.reshape(orig_shape)


if __name__ == "__main__":
    key = jax.random.PRNGKey(0)
    k_mu, k_lv, k_mu2, k_lv2 = jax.random.split(key, 4)

    # Small, VAE-typical shape: batch=32, latent dim=48 (< 128 lanes: exercises
    # the lane-dense repacking + padding path).
    B, D = 32, 48
    mu = jax.random.normal(k_mu, (B, D), dtype=jnp.float32)
    logvar = jax.random.normal(k_lv, (B, D), dtype=jnp.float32) * 0.1
    z = jax.block_until_ready(vae_sample(mu, logvar, seed=1234))
    assert z.shape == (B, D) and z.dtype == jnp.float32
    assert bool(jnp.all(jnp.isfinite(z)))
    eps_hat = (z - mu) / jnp.exp(0.5 * logvar)
    assert abs(float(jnp.mean(eps_hat))) < 0.15
    assert 0.85 < float(jnp.std(eps_hat)) < 1.15

    # Larger bf16 check: exercises the multi-step "parallel" grid, row padding,
    # and bf16 streaming with f32 in-kernel math.
    B2, D2 = 4096, 300
    mu_b = jax.random.normal(k_mu2, (B2, D2), dtype=jnp.float32).astype(jnp.bfloat16)
    lv_b = (jax.random.normal(k_lv2, (B2, D2), dtype=jnp.float32) * 0.1).astype(jnp.bfloat16)
    z_b = jax.block_until_ready(vae_sample(mu_b, lv_b, seed=7))
    assert z_b.shape == (B2, D2) and z_b.dtype == jnp.bfloat16
    eps_hat_b = (z_b.astype(jnp.float32) - mu_b.astype(jnp.float32)) / jnp.exp(
        0.5 * lv_b.astype(jnp.float32))
    assert bool(jnp.all(jnp.isfinite(eps_hat_b)))
    assert abs(float(jnp.mean(eps_hat_b))) < 0.05
    assert 0.9 < float(jnp.std(eps_hat_b)) < 1.1

    print("KERNEL_OK")
</pallas_src>

<mosaic_0001>
module attributes {stable_mosaic.version = 11 : i64} {
  func.func @_vae_sample_fused_kernel(%arg0: i32, %arg1: memref<6x256xf32, #tpu.memory_space<vmem>>, %arg2: memref<6x256xf32, #tpu.memory_space<vmem>>, %arg3: memref<6x256xf32, #tpu.memory_space<vmem>>, %arg4: memref<6x256xf32, #tpu.memory_space<vmem>>) attributes {dimension_semantics = [#tpu.dimension_semantics<parallel>], iteration_bounds = array<i64: 1>, scalar_prefetch = 0 : i64, scratch_operands = 0 : i64, tpu.core_type = #tpu.core_type<tc>, window_params = [{transform_indices = @transform_0, window_bounds = array<i64: 6, 256>}, {transform_indices = @transform_1, window_bounds = array<i64: 6, 256>}, {transform_indices = @transform_2, window_bounds = array<i64: 6, 256>}, {transform_indices = @transform_3, window_bounds = array<i64: 6, 256>}]} {
    %c0 = arith.constant 0 : index
    %c0_0 = arith.constant 0 : index
    %0 = vector.load %arg2[%c0, %c0_0] : memref<6x256xf32, #tpu.memory_space<vmem>>, vector<6x256xf32>
    %cst = arith.constant 5.000000e-01 : f32
    %1 = vector.broadcast %cst : f32 to vector<6x256xf32>
    %2 = arith.mulf %1, %0 : vector<6x256xf32>
    %3 = math.exp %2 : vector<6x256xf32>
    %c0_1 = arith.constant 0 : index
    %c0_2 = arith.constant 0 : index
    %4 = vector.load %arg1[%c0_1, %c0_2] : memref<6x256xf32, #tpu.memory_space<vmem>>, vector<6x256xf32>
    %c0_3 = arith.constant 0 : index
    %c0_4 = arith.constant 0 : index
    %5 = vector.load %arg3[%c0_3, %c0_4] : memref<6x256xf32, #tpu.memory_space<vmem>>, vector<6x256xf32>
    %6 = arith.mulf %5, %3 : vector<6x256xf32>
    %7 = arith.addf %4, %6 : vector<6x256xf32>
    %c0_5 = arith.constant 0 : index
    %c0_6 = arith.constant 0 : index
    %8 = vector.load %arg4[%c0_5, %c0_6] : memref<6x256xf32, #tpu.memory_space<vmem>>, vector<6x256xf32>
    tpu.vector_store %arg4[%c0_5, %c0_6], %7 {strides = array<i32>} : memref<6x256xf32, #tpu.memory_space<vmem>>, vector<6x256xf32>,
    return
  }
  func.func @transform_0(%arg0: i32) -> (i32, i32) {
    %c0_i32 = arith.constant 0 : i32
    %c0_i32_0 = arith.constant 0 : i32
    return %arg0, %c0_i32 : i32, i32
  }
  func.func @transform_1(%arg0: i32) -> (i32, i32) {
    %c0_i32 = arith.constant 0 : i32
    %c0_i32_0 = arith.constant 0 : i32
    return %arg0, %c0_i32 : i32, i32
  }
  func.func @transform_2(%arg0: i32) -> (i32, i32) {
    %c0_i32 = arith.constant 0 : i32
    %c0_i32_0 = arith.constant 0 : i32
    return %arg0, %c0_i32 : i32, i32
  }
  func.func @transform_3(%arg0: i32) -> (i32, i32) {
    %c0_i32 = arith.constant 0 : i32
    %c0_i32_0 = arith.constant 0 : i32
    return %arg0, %c0_i32 : i32, i32
  }
}

</mosaic_0001>

<bundles_post_ra>
// kernel: tpu_custom_call.1
= control target key start
LH: loop header
LB: loop body
LE: loop exit
PB: predicated region body
PF: predicated region fallthrough
CT: control target
= control target key end

     0   :  { %8 = vsyncpa [#allocation3], 0  ;;  %s258_s0 = inlined_call_operand.hbm [shape: f32[6,256], index: 0, kind: input, shape index: {}]   ;;  %s259_s1 = inlined_call_operand.hbm [shape: f32[6,256], index: 1, kind: input, shape index: {}]   ;;  %s260_s2 = inlined_call_operand.hbm [shape: f32[6,256], index: 2, kind: input, shape index: {}]   ;;  %s261_s3 = inlined_call_operand.hbm [shape: f32[6,256], index: 3, kind: output, shape index: {}]  }
   0x1   :  { %9 = vsyncpa [#allocation6], 0 }
   0x2   :  { %10 = vsyncpa [#allocation4], 0  ;;  %s186_s12 = smov [#allocation5]   ;;  %s187_s14 = smov [#allocation2]  }
   0x3   :  { %s27_s13 = sshll.u32 %s186_s12, 4  ;;  %s17_s15 = sshll.u32 %s187_s14, 4  ;;  %s28_s13 = int_to_ptr.vmem [resolvable:$true] %s27_s13  ;;  %s18_s15 = int_to_ptr.vmem [resolvable:$true] %s17_s15 }
   0x4   :  { %s92_s18 = scalar_lea.hbm %s259_s1, 256 }
   0x5   :  { %p93_p0 = scmp.ne.s32.totalorder %s259_s1, %s92_s18  ;;  %p96_p1 = scmp.lt.u32.totalorder %s92_s18, %s259_s1 }
   0x7   :  { %p98_p2 = pnand %p96_p1, %p93_p0 }
   0x9   :  { %101 = shalt.err (!%p98_p2)
}
   0xa   :  { %s102_s23 = scalar_lea.vmem %s28_s13, 256  ;;  %p107_p4 = scmp.lt.s32.totalorder %s28_s13, %s28_s13 }
   0xb   :  { %p103_p3 = scmp.ne.s32.totalorder %s28_s13, %s102_s23  ;;  %p108_p5 = scmp.lt.s32.totalorder %s102_s23, %s102_s23 }
   0xd   :  { %p109_p6 = por %p108_p5, %p107_p4 }
   0xf   :  { %p110_p7 = pnand %p109_p6, %p103_p3 }
  0x11   :  { %113 = shalt.err (!%p110_p7)
}
  0x12   :  { %30 = dma.hbm_to_vmem [thread:$0]  %s259_s1, 256, %s28_s13, [#allocation6]  }
  0x13   :  { %s114_s28 = scalar_lea.hbm %s258_s0, 256 }
  0x14   :  { %p115_p8 = scmp.ne.s32.totalorder %s258_s0, %s114_s28  ;;  %p118_p9 = scmp.lt.u32.totalorder %s114_s28, %s258_s0 }
  0x16   :  { %p120_p10 = pnand %p118_p9, %p115_p8 }
  0x18   :  { %123 = shalt.err (!%p120_p10)
}
  0x19   :  { %s124_s6 = scalar_lea.vmem %s18_s15, 256  ;;  %p129_p12 = scmp.lt.s32.totalorder %s18_s15, %s18_s15 }
  0x1a   :  { %p125_p11 = scmp.ne.s32.totalorder %s18_s15, %s124_s6  ;;  %p130_p13 = scmp.lt.s32.totalorder %s124_s6, %s124_s6 }
  0x1c   :  { %p131_p0 = por %p130_p13, %p129_p12 }
  0x1e   :  { %p132_p1 = pnand %p131_p0, %p125_p11 }
  0x20   :  { %135 = shalt.err (!%p132_p1)
}
  0x21   :  { %20 = dma.hbm_to_vmem [thread:$0]  %s258_s0, 256, %s18_s15, [#allocation3]  }
  0x22   :  { %s188_s8 = smov [#allocation7]   ;;  %s136_s12 = scalar_lea.hbm %s260_s2, 256 }
  0x23   :  { %s37_s9 = sshll.u32 %s188_s8, 4  ;;  %p137_p2 = scmp.ne.s32.totalorder %s260_s2, %s136_s12  ;;  %s38_s9 = int_to_ptr.vmem [resolvable:$true] %s37_s9 }
  0x24   :  { %p140_p3 = scmp.lt.u32.totalorder %s136_s12, %s260_s2 }
  0x26   :  { %p142_p4 = pnand %p140_p3, %p137_p2 }
  0x28   :  { %145 = shalt.err (!%p142_p4)
}
  0x29   :  { %s146_s18 = scalar_lea.vmem %s38_s9, 256  ;;  %p151_p6 = scmp.lt.s32.totalorder %s38_s9, %s38_s9 }
  0x2a   :  { %p147_p5 = scmp.ne.s32.totalorder %s38_s9, %s146_s18  ;;  %p152_p7 = scmp.lt.s32.totalorder %s146_s18, %s146_s18 }
  0x2c   :  { %p153_p8 = por %p152_p7, %p151_p6 }
  0x2e   :  { %p154_p9 = pnand %p153_p8, %p147_p5 }
  0x30   :  { %157 = shalt.err (!%p154_p9)
}
  0x31   :  { %40 = dma.hbm_to_vmem [thread:$0]  %s260_s2, 256, %s38_s9, [#allocation6]  }
  0x32   :  { %180 = dma.done.wait [#allocation3], 256  }
  0x33   :  { %181 = vsyncadd [#allocation3], 4294967040 }
  0x34   :  { %182 = dma.done.wait [#allocation6], 512  }
  0x35   :  { %183 = vsyncadd [#allocation6], 4294966784  ;;  %v50_v0 = vld [vmem:[#allocation5] sm:$0x3f]  ;;  %v51_v2 = vld [vmem:[#allocation5 + $0x8] sm:$0x3f] }
  0x36   :  { %v52_v1 = vmul.f32 0.5, %v50_v0  ;;  %v53_v3 = vmul.f32 0.5, %v51_v2  ;;  %v60_v6 = vld [vmem:[#allocation7] sm:$0x3f]  ;;  %v61_v7 = vld [vmem:[#allocation7 + $0x8] sm:$0x3f] }
  0x37   :  { %v58_v9 = vld [vmem:[#allocation2] sm:$0x3f]  ;;  %v59_v12 = vld [vmem:[#allocation2 + $0x8] sm:$0x3f]  ;;  %s189_s2 = smov [#allocation8]  }
  0x38   :  { %v54_v4 = vmul.f32 1.442695, %v52_v1  ;;  %v56_v5 = vmul.f32 1.442695, %v53_v3  ;;  %s74_s19 = sshll.u32 %s189_s2, 4  ;;  %s75_s19 = int_to_ptr.vmem [resolvable:$true] %s74_s19 }
  0x39   :  { %s158_s20 = scalar_lea.vmem %s75_s19, 256  ;;  %p163_p11 = scmp.lt.s32.totalorder %s75_s19, %s75_s19 }
  0x3a   :  { %88 = vpow2.f32 %v54_v4  ;;  %p159_p10 = scmp.ne.s32.totalorder %s75_s19, %s158_s20  ;;  %p164_p12 = scmp.lt.s32.totalorder %s158_s20, %s158_s20 }
  0x3b   :  { %90 = vpow2.f32 %v56_v5 }
  0x3c   :  { %p165_p13 = por %p164_p12, %p163_p11 }
  0x3e   :  { %p166_p0 = pnand %p165_p13, %p159_p10 }
  0x44   :  { %v89_v8 = vpop.eup %88 }
  0x45   :  { %v91_v10 = vpop.eup %90  ;;  %v62_v11 = vmul.f32 %v89_v8, %v60_v6 }
  0x46   :  { %v63_v13 = vmul.f32 %v91_v10, %v61_v7 }
  0x47   :  { %v64_v14 = vadd.f32 %v62_v11, %v58_v9 }
  0x48   :  { %v65_v15 = vadd.f32 %v63_v13, %v59_v12 }
  0x49   :  { %66 = vst [vmem:[#allocation8] sm:$0x3f] %v64_v14 }
  0x4a   :  { %67 = vst [vmem:[#allocation8 + $0x8] sm:$0x3f] %v65_v15 }
  0x4b   :  { %169 = shalt.err (!%p166_p0)
}
  0x4c   :  { %s170_s23 = scalar_lea.hbm %s261_s3, 256 }
  0x4d   :  { %p171_p1 = scmp.ne.s32.totalorder %s261_s3, %s170_s23  ;;  %p174_p2 = scmp.lt.u32.totalorder %s170_s23, %s261_s3 }
  0x4f   :  { %p176_p3 = pnand %p174_p2, %p171_p1 }
  0x51   :  { %179 = shalt.err (!%p176_p3)
}
  0x52   :  { %77 = dma.vmem_to_hbm [thread:$0]  %s75_s19, 256, %s261_s3, [#allocation4]  }
  0x53   :  { %184 = dma.done.wait [#allocation4], 256  }
  0x54   :  { %185 = vsyncadd [#allocation4], 4294967040 }
  0x55   :  { %81 = vsyncpa [#allocation3], 1 }
  0x56   :  { %82 = vsyncpa [#allocation6], 1 }
  0x57   :  { %83 = vsyncpa [#allocation4], 1 }

</bundles_post_ra>
